<compile_context>
chip_gen: v5e
topology: v5e:2x2
jax: 0.10.0
libtpu: 0.0.40
codegen_flags: <defaults>
</compile_context>

<pallas_src>
import functools

import jax
import jax.numpy as jnp
from jax.experimental import pallas as pl
from jax.experimental.pallas import tpu as pltpu

KSIZE = 5             # Conv1d kernel_size
NEG_SLOPE = 0.01      # F.leaky_relu default negative slope
HIDDEN = 100          # logical hidden width
HPAD = 128            # hidden padded to one full lane row (col 100 = bias channel)

# Batch tile.  VMEM budget is against *lane-padded* footprints: every (tb, X<=128)
# f32 buffer occupies tb*128*4 = 512 B/row in VMEM:
#   s in (2x double-buffered) + a in (2x) + q out (2x, (tb,1) lane-pads to 128)
#   + ~4 live (tb,128)-padded f32 intermediates (conv acc, u, h, h*w_out)
#   => ~5 KiB/row f32 worst case -> ~40 MiB at tb=8192 (bf16 inputs shave ~1 KiB/row),
#   under the 56 MiB scoped request and under v7x's 64 MiB physical VMEM.
TB_MAX = 8192
VMEM_LIMIT_BYTES = 56 * 1024 * 1024


def _leaky_relu(x):
    return jnp.where(x >= 0, x, NEG_SLOPE * x)


def _round_up(x, m):
    return ((x + m - 1) // m) * m


def _cnet_kernel(lc, s_ref, a_ref, cw_ref, cb_ref, w1_ref, b1_ref, wout_ref, o_ref):
    """One batch tile: s=(tb, s_dim), a=(tb, a_dim) -> q=(tb, 1)."""
    # ---- Stage 1: 5-tap Conv1d on the VPU/XLU (static lane-offset slices +
    # multiply-adds), keeping the MXU free for the single stage-2 matmul.
    s_t = s_ref[...].astype(jnp.float32)                       # (tb, s_dim)
    conv = cw_ref[0] * s_t[:, 0:lc]
    for k in range(1, KSIZE):
        conv = conv + cw_ref[k] * s_t[:, k:k + lc]             # lane-shifted taps
    conv = _leaky_relu(conv + cb_ref[0])                       # exact f32 conv

    # ---- Stage 2: ONE fused (fcs|fca) matmul into the 128-padded hidden.
    a_t = a_ref[...].astype(jnp.float32)                       # (tb, a_dim)
    u = jnp.concatenate([conv, a_t], axis=-1)                  # (tb, lc + a_dim)
    h = jnp.dot(u.astype(w1_ref.dtype), w1_ref[...],
                preferred_element_type=jnp.float32)            # (tb, 128), f32 acc
    h = _leaky_relu(h + b1_ref[...])

    # ---- Head: width-1 output as a VPU multiply + lane reduction (no N=1 MXU
    # matmul).  out_b rides on the constant bias channel:
    # b1[...,100]=1 -> h[...,100]=1 after leaky, and w_out[...,100]=out_b.
    o_ref[...] = jnp.sum(h * wout_ref[...], axis=-1, keepdims=True)
    # TODO(synk): if a bundle dump ever shows v5e vst pressure, switch to a
    # lane-dense (1, tb) transposed output instead of this (tb, 1) masked store.


def prepare_params(params, s_dim, a_dim, compute_dtype=jnp.bfloat16):
    """Build the fused/padded matrices and SMEM scalars consumed by the kernel."""
    lc = s_dim - KSIZE + 1
    dm = lc + a_dim

    # Fused stage-2 weight [fcs_wT ; fca_wT], padded to 128 hidden columns.
    w1 = jnp.zeros((dm, HPAD), jnp.float32)
    w1 = w1.at[:lc, :HIDDEN].set(params["fcs_wT"].astype(jnp.float32))
    w1 = w1.at[lc:, :HIDDEN].set(params["fca_wT"].astype(jnp.float32))

    b1 = jnp.zeros((1, HPAD), jnp.float32)
    b1 = b1.at[:, :HIDDEN].set(params["fcs_b"].astype(jnp.float32)
                               + params["fca_b"].astype(jnp.float32))
    b1 = b1.at[0, HIDDEN].set(1.0)            # constant bias channel (=1 after leaky)

    # Head row: out weights + out_b riding on the bias channel.
    w_out = jnp.zeros((1, HPAD), jnp.float32)
    w_out = w_out.at[:, :HIDDEN].set(params["out_wT"].astype(jnp.float32).T)
    w_out = w_out.at[0, HIDDEN].set(params["out_b"][0, 0])

    return {
        "conv_w": params["conv_w"].astype(jnp.float32).reshape((KSIZE,)),
        "conv_b": params["conv_b"].astype(jnp.float32).reshape((1,)),
        "w1": w1.astype(compute_dtype),
        "b1": b1,
        "w_out": w_out,
        "lc": lc, "dm": dm,
    }


def cnet_forward(params, s, a, *, tb=None, compute_dtype=jnp.bfloat16):
    """s: (1, B, s_dim), a: (1, B, a_dim) -> (1, B, 1), matching the PyTorch CNet."""
    assert s.ndim == 3 and a.ndim == 3 and s.shape[0] == 1 and a.shape[0] == 1
    B = s.shape[1]
    s_dim, a_dim = s.shape[2], a.shape[2]
    assert a.shape[1] == B and s_dim >= KSIZE

    lc = s_dim - KSIZE + 1
    dm = lc + a_dim
    p = prepare_params(params, s_dim, a_dim, compute_dtype)

    # Activations go straight into the kernel as two tiled streams — no concat /
    # full-tile zero-pad copies in HBM.  Only a <8-row alignment pad remains for
    # odd batch sizes (e.g. the demo's B=2).
    s2, a2 = s[0], a[0]
    b_pad = _round_up(B, 8)
    if b_pad != B:
        s2 = jnp.pad(s2, ((0, b_pad - B), (0, 0)))
        a2 = jnp.pad(a2, ((0, b_pad - B), (0, 0)))

    # Batch tile: as large as the VMEM budget allows (amortizes the ~0.35 us
    # per-grid-step overhead) but always >= 2 grid steps once b_pad > TB_MAX so
    # the "parallel" axis can shard across v7x's two TensorCores.  The batch
    # tail is a partial last block (Pallas masks OOB rows on write), not an HBM
    # zero-pad.
    if tb is None:
        if b_pad <= TB_MAX:
            tb = b_pad
        else:
            nsteps = max(2, pl.cdiv(b_pad, TB_MAX))
            tb = pl.cdiv(b_pad, nsteps)
    tb = _round_up(min(int(tb), b_pad), 8)
    grid = (pl.cdiv(b_pad, tb),)

    kernel = functools.partial(_cnet_kernel, lc)

    flops = 2 * b_pad * (KSIZE * lc + dm * HPAD + HPAD)
    bytes_acc = (int(s2.size) * s2.dtype.itemsize + int(a2.size) * a2.dtype.itemsize
                 + b_pad * 4
                 + int(p["w1"].size) * p["w1"].dtype.itemsize
                 + (2 * HPAD + KSIZE + 1) * 4)

    out = pl.pallas_call(
        kernel,
        out_shape=jax.ShapeDtypeStruct((b_pad, 1), jnp.float32),
        grid=grid,
        in_specs=[
            pl.BlockSpec((tb, s_dim), lambda i: (i, 0)),          # s (tiled)
            pl.BlockSpec((tb, a_dim), lambda i: (i, 0)),          # a (tiled)
            pl.BlockSpec(memory_space=pltpu.MemorySpace.SMEM),    # conv_w (5,) scalars
            pl.BlockSpec(memory_space=pltpu.MemorySpace.SMEM),    # conv_b (1,) scalar
            pl.BlockSpec((dm, HPAD), lambda i: (0, 0)),           # fused W1 (resident)
            pl.BlockSpec((1, HPAD), lambda i: (0, 0)),            # fused b1 (+bias ch.)
            pl.BlockSpec((1, HPAD), lambda i: (0, 0)),            # head row (+out_b)
        ],
        out_specs=pl.BlockSpec((tb, 1), lambda i: (i, 0)),
        compiler_params=pltpu.CompilerParams(
            dimension_semantics=("parallel",),
            vmem_limit_bytes=VMEM_LIMIT_BYTES),
        cost_estimate=pl.CostEstimate(
            flops=flops, transcendentals=0, bytes_accessed=bytes_acc),
    )(s2, a2, p["conv_w"], p["conv_b"], p["w1"], p["b1"], p["w_out"])

    return out[:B][None]                                          # (1, B, 1)


def cnet_reference(params, s, a):
    """Pure-JAX reference of the original PyTorch forward (for correctness)."""
    s2 = s[0].astype(jnp.float32)
    a2 = a[0].astype(jnp.float32)
    lc = params["fcs_wT"].shape[0]
    windows = jnp.stack([s2[:, k:k + lc] for k in range(KSIZE)], axis=0)
    conv = jnp.einsum("k,kbl->bl", params["conv_w"], windows) + params["conv_b"][0]
    conv = jnp.where(conv >= 0, conv, NEG_SLOPE * conv)
    x = conv @ params["fcs_wT"] + params["fcs_b"]
    y = a2 @ params["fca_wT"] + params["fca_b"]
    pre = x + y
    net = jnp.where(pre >= 0, pre, NEG_SLOPE * pre)
    return (net @ params["out_wT"] + params["out_b"])[None]


def init_params(key, s_dim, a_dim):
    lc = s_dim - KSIZE + 1
    ks = jax.random.split(key, 8)
    return {
        "conv_w": (0.1 * jax.random.normal(ks[0], (KSIZE,))).astype(jnp.float32),
        "conv_b": (0.1 * jax.random.normal(ks[1], (1,))).astype(jnp.float32),
        "fcs_wT": (0.1 * jax.random.normal(ks[2], (lc, HIDDEN))).astype(jnp.float32),
        "fcs_b":  (0.1 * jax.random.normal(ks[3], (1, HIDDEN))).astype(jnp.float32),
        "fca_wT": (0.1 * jax.random.normal(ks[4], (a_dim, HIDDEN))).astype(jnp.float32),
        "fca_b":  (0.1 * jax.random.normal(ks[5], (1, HIDDEN))).astype(jnp.float32),
        "out_wT": (0.1 * jax.random.normal(ks[6], (HIDDEN, 1))).astype(jnp.float32),
        "out_b":  (0.1 * jax.random.normal(ks[7], (1, 1))).astype(jnp.float32),
    }


if __name__ == "__main__":
    key = jax.random.PRNGKey(0)
    B, S_DIM, A_DIM = 2, 16, 8

    kp, ksx, kax = jax.random.split(key, 3)
    params = init_params(kp, S_DIM, A_DIM)
    s = jax.random.normal(ksx, (1, B, S_DIM), dtype=jnp.float32)
    a = jax.random.normal(kax, (1, B, A_DIM), dtype=jnp.float32)

    ref = jax.block_until_ready(cnet_reference(params, s, a))

    # f32 weights: conv is exact f32 on the VPU; only the fused stage-2 matmul
    # goes through the MXU's default reduced-precision f32 path.
    out_f32 = jax.block_until_ready(
        cnet_forward(params, s, a, compute_dtype=jnp.float32))
    assert out_f32.shape == (1, B, 1), out_f32.shape
    assert jnp.allclose(out_f32, ref, atol=5e-3, rtol=5e-3), (out_f32, ref)

    # Default path: bf16 stage-2 weight/operands (f32 accumulation) — looser check.
    out_bf16 = jax.block_until_ready(cnet_forward(params, s, a))
    assert out_bf16.shape == (1, B, 1), out_bf16.shape
    assert jnp.allclose(out_bf16, ref, atol=5e-2, rtol=5e-2), (out_bf16, ref)

    # Exercise the multi-step grid + partial last block (tail masking) path.
    B2 = 20
    ks2, ka2 = jax.random.split(jax.random.PRNGKey(1), 2)
    s_big = jax.random.normal(ks2, (1, B2, S_DIM), dtype=jnp.float32)
    a_big = jax.random.normal(ka2, (1, B2, A_DIM), dtype=jnp.float32)
    ref_big = jax.block_until_ready(cnet_reference(params, s_big, a_big))
    out_big = jax.block_until_ready(
        cnet_forward(params, s_big, a_big, tb=16, compute_dtype=jnp.float32))
    assert out_big.shape == (1, B2, 1), out_big.shape
    assert jnp.allclose(out_big, ref_big, atol=5e-3, rtol=5e-3), (out_big, ref_big)

    print("KERNEL_OK")
</pallas_src>

<mosaic_0001>
module attributes {stable_mosaic.version = 11 : i64} {
  func.func @_cnet_kernel(%arg0: i32, %arg1: memref<8x16xf32, #tpu.memory_space<vmem>>, %arg2: memref<8x8xf32, #tpu.memory_space<vmem>>, %arg3: memref<5xf32, #tpu.memory_space<smem>>, %arg4: memref<1xf32, #tpu.memory_space<smem>>, %arg5: memref<20x128xf32, #tpu.memory_space<vmem>>, %arg6: memref<1x128xf32, #tpu.memory_space<vmem>>, %arg7: memref<1x128xf32, #tpu.memory_space<vmem>>, %arg8: memref<8x1xf32, #tpu.memory_space<vmem>>) attributes {dimension_semantics = [#tpu.dimension_semantics<parallel>], iteration_bounds = array<i64: 1>, scalar_prefetch = 0 : i64, scratch_operands = 0 : i64, tpu.core_type = #tpu.core_type<tc>, window_params = [{transform_indices = @transform_0, window_bounds = array<i64: 8, 16>}, {transform_indices = @transform_1, window_bounds = array<i64: 8, 8>}, {transform_indices = @transform_2, window_bounds = array<i64: 5>}, {transform_indices = @transform_3, window_bounds = array<i64: 1>}, {pipeline_mode = #tpu.pipeline_mode<synchronous>, transform_indices = @transform_4, window_bounds = array<i64: 20, 128>}, {pipeline_mode = #tpu.pipeline_mode<synchronous>, transform_indices = @transform_5, window_bounds = array<i64: 1, 128>}, {pipeline_mode = #tpu.pipeline_mode<synchronous>, transform_indices = @transform_6, window_bounds = array<i64: 1, 128>}, {transform_indices = @transform_7, window_bounds = array<i64: 8, 1>}]} {
    %c0 = arith.constant 0 : index
    %c0_0 = arith.constant 0 : index
    %0 = vector.load %arg1[%c0, %c0_0] : memref<8x16xf32, #tpu.memory_space<vmem>>, vector<8x16xf32>
    %c0_1 = arith.constant 0 : index
    %1 = memref.load %arg3[%c0_1] : memref<5xf32, #tpu.memory_space<smem>>
    %2 = vector.extract_strided_slice %0 {offsets = [0, 0], sizes = [8, 12], strides = [1, 1]} : vector<8x16xf32> to vector<8x12xf32>
    %3 = vector.broadcast %1 : f32 to vector<8x12xf32>
    %4 = arith.mulf %3, %2 : vector<8x12xf32>
    %c1 = arith.constant 1 : index
    %5 = memref.load %arg3[%c1] : memref<5xf32, #tpu.memory_space<smem>>
    %6 = vector.extract_strided_slice %0 {offsets = [0, 1], sizes = [8, 12], strides = [1, 1]} : vector<8x16xf32> to vector<8x12xf32>
    %7 = vector.broadcast %5 : f32 to vector<8x12xf32>
    %8 = arith.mulf %7, %6 : vector<8x12xf32>
    %9 = arith.addf %4, %8 : vector<8x12xf32>
    %c2 = arith.constant 2 : index
    %10 = memref.load %arg3[%c2] : memref<5xf32, #tpu.memory_space<smem>>
    %11 = vector.extract_strided_slice %0 {offsets = [0, 2], sizes = [8, 12], strides = [1, 1]} : vector<8x16xf32> to vector<8x12xf32>
    %12 = vector.broadcast %10 : f32 to vector<8x12xf32>
    %13 = arith.mulf %12, %11 : vector<8x12xf32>
    %14 = arith.addf %9, %13 : vector<8x12xf32>
    %c3 = arith.constant 3 : index
    %15 = memref.load %arg3[%c3] : memref<5xf32, #tpu.memory_space<smem>>
    %16 = vector.extract_strided_slice %0 {offsets = [0, 3], sizes = [8, 12], strides = [1, 1]} : vector<8x16xf32> to vector<8x12xf32>
    %17 = vector.broadcast %15 : f32 to vector<8x12xf32>
    %18 = arith.mulf %17, %16 : vector<8x12xf32>
    %19 = arith.addf %14, %18 : vector<8x12xf32>
    %c4 = arith.constant 4 : index
    %20 = memref.load %arg3[%c4] : memref<5xf32, #tpu.memory_space<smem>>
    %21 = vector.extract_strided_slice %0 {offsets = [0, 4], sizes = [8, 12], strides = [1, 1]} : vector<8x16xf32> to vector<8x12xf32>
    %22 = vector.broadcast %20 : f32 to vector<8x12xf32>
    %23 = arith.mulf %22, %21 : vector<8x12xf32>
    %24 = arith.addf %19, %23 : vector<8x12xf32>
    %c0_2 = arith.constant 0 : index
    %25 = memref.load %arg4[%c0_2] : memref<1xf32, #tpu.memory_space<smem>>
    %26 = vector.broadcast %25 : f32 to vector<8x12xf32>
    %27 = arith.addf %24, %26 : vector<8x12xf32>
    %cst = arith.constant 0.000000e+00 : f32
    %28 = vector.broadcast %cst : f32 to vector<8x12xf32>
    %29 = arith.cmpf oge, %27, %28 : vector<8x12xf32>
    %cst_3 = arith.constant 0.00999999977 : f32
    %30 = vector.broadcast %cst_3 : f32 to vector<8x12xf32>
    %31 = arith.mulf %30, %27 : vector<8x12xf32>
    %32 = arith.select %29, %27, %31 : vector<8x12xi1>, vector<8x12xf32>
    %c0_4 = arith.constant 0 : index
    %c0_5 = arith.constant 0 : index
    %33 = vector.load %arg2[%c0_4, %c0_5] : memref<8x8xf32, #tpu.memory_space<vmem>>, vector<8x8xf32>
    %34 = tpu.concatenate %32, %33 in 1 : vector<8x12xf32>, vector<8x8xf32> -> vector<8x20xf32>
    %c0_6 = arith.constant 0 : index
    %c0_7 = arith.constant 0 : index
    %35 = vector.load %arg5[%c0_6, %c0_7] : memref<20x128xf32, #tpu.memory_space<vmem>>, vector<20x128xf32>
    %cst_8 = arith.constant dense<0.000000e+00> : vector<8x128xf32>
    %36 = tpu.matmul %34, %35, %cst_8 {dimension_numbers = #tpu.dot_dimension_numbers<[1], [0], [0], [1], [0, 0, 1, 1], [], []>} : vector<8x20xf32>, vector<20x128xf32>, vector<8x128xf32> -> vector<8x128xf32>
    %c0_9 = arith.constant 0 : index
    %c0_10 = arith.constant 0 : index
    %37 = vector.load %arg6[%c0_9, %c0_10] : memref<1x128xf32, #tpu.memory_space<vmem>>, vector<1x128xf32>
    %38 = vector.broadcast %37 : vector<1x128xf32> to vector<8x128xf32>
    %39 = arith.addf %36, %38 : vector<8x128xf32>
    %cst_11 = arith.constant 0.000000e+00 : f32
    %40 = vector.broadcast %cst_11 : f32 to vector<8x128xf32>
    %41 = arith.cmpf oge, %39, %40 : vector<8x128xf32>
    %cst_12 = arith.constant 0.00999999977 : f32
    %42 = vector.broadcast %cst_12 : f32 to vector<8x128xf32>
    %43 = arith.mulf %42, %39 : vector<8x128xf32>
    %44 = arith.select %41, %39, %43 : vector<8x128xi1>, vector<8x128xf32>
    %c0_13 = arith.constant 0 : index
    %c0_14 = arith.constant 0 : index
    %45 = vector.load %arg7[%c0_13, %c0_14] : memref<1x128xf32, #tpu.memory_space<vmem>>, vector<1x128xf32>
    %46 = vector.broadcast %45 : vector<1x128xf32> to vector<8x128xf32>
    %47 = arith.mulf %44, %46 : vector<8x128xf32>
    %cst_15 = arith.constant dense<0.000000e+00> : vector<8xf32>
    %48 = vector.multi_reduction <add>, %47, %cst_15 [1] : vector<8x128xf32> to vector<8xf32>
    %49 = vector.shape_cast %48 : vector<8xf32> to vector<8x1xf32>
    %c0_16 = arith.constant 0 : index
    %c0_17 = arith.constant 0 : index
    %50 = vector.load %arg8[%c0_16, %c0_17] : memref<8x1xf32, #tpu.memory_space<vmem>>, vector<8x1xf32>
    tpu.vector_store %arg8[%c0_16, %c0_17], %49 {strides = array<i32>} : memref<8x1xf32, #tpu.memory_space<vmem>>, vector<8x1xf32>,
    return
  }
  func.func @transform_0(%arg0: i32) -> (i32, i32) {
    %c0_i32 = arith.constant 0 : i32
    %c0_i32_0 = arith.constant 0 : i32
    return %arg0, %c0_i32 : i32, i32
  }
  func.func @transform_1(%arg0: i32) -> (i32, i32) {
    %c0_i32 = arith.constant 0 : i32
    %c0_i32_0 = arith.constant 0 : i32
    return %arg0, %c0_i32 : i32, i32
  }
  func.func @transform_2(%arg0: i32) -> i32 {
    %c0_i32 = arith.constant 0 : i32
    %c0_i32_0 = arith.constant 0 : i32
    return %c0_i32 : i32
  }
  func.func @transform_3(%arg0: i32) -> i32 {
    %c0_i32 = arith.constant 0 : i32
    %c0_i32_0 = arith.constant 0 : i32
    return %c0_i32 : i32
  }
  func.func @transform_4(%arg0: i32) -> (i32, i32) {
    %c0_i32 = arith.constant 0 : i32
    %c0_i32_0 = arith.constant 0 : i32
    %c0_i32_1 = arith.constant 0 : i32
    return %c0_i32, %c0_i32_0 : i32, i32
  }
  func.func @transform_5(%arg0: i32) -> (i32, i32) {
    %c0_i32 = arith.constant 0 : i32
    %c0_i32_0 = arith.constant 0 : i32
    %c0_i32_1 = arith.constant 0 : i32
    return %c0_i32, %c0_i32_0 : i32, i32
  }
  func.func @transform_6(%arg0: i32) -> (i32, i32) {
    %c0_i32 = arith.constant 0 : i32
    %c0_i32_0 = arith.constant 0 : i32
    %c0_i32_1 = arith.constant 0 : i32
    return %c0_i32, %c0_i32_0 : i32, i32
  }
  func.func @transform_7(%arg0: i32) -> (i32, i32) {
    %c0_i32 = arith.constant 0 : i32
    %c0_i32_0 = arith.constant 0 : i32
    return %arg0, %c0_i32 : i32, i32
  }
}

</mosaic_0001>

<bundles_post_ra>
// kernel: tpu_custom_call.1
= control target key start
LH: loop header
LB: loop body
LE: loop exit
PB: predicated region body
PF: predicated region fallthrough
CT: control target
= control target key end

     0   :  { %13 = vsyncpa [#allocation4], 0  ;;  %s372_s0 = inlined_call_operand.hbm [shape: f32[8,16], index: 0, kind: input, shape index: {}]   ;;  %s373_s1 = inlined_call_operand.hbm [shape: f32[8,8], index: 1, kind: input, shape index: {}]   ;;  %s374_s2 = inlined_call_operand.vmem [shape: f32[5], index: 2, kind: input, shape index: {}]   ;;  %s375_s3 = inlined_call_operand.<no memory space> [shape: f32[1], index: 3, kind: input, shape index: {}]   ;;  %s376_s4 = inlined_call_operand.hbm [shape: f32[20,128], index: 4, kind: input, shape index: {}]   ;;  %s377_s5 = inlined_call_operand.vmem [shape: f32[1,128], index: 5, kind: input, shape index: {}]   ;;  %s378_s6 = inlined_call_operand.vmem [shape: f32[1,128], index: 6, kind: input, shape index: {}]   ;;  %s379_s7 = inlined_call_operand.vmem [shape: f32[8,1], index: 7, kind: output, shape index: {}]  }
   0x1   :  { %14 = vsyncpa [#allocation7], 0  ;;  %s32_s26 = sshll.u32 %s373_s1, 4  ;;  %s33_s26 = int_to_ptr.hbm [resolvable:$true] %s32_s26 }
   0x2   :  { %15 = vsyncpa [#allocation5], 0  ;;  %s297_s27 = smov [#allocation6]   ;;  %s21_s8 = sshll.u32 %s372_s0, 4  ;;  %s22_s8 = int_to_ptr.hbm [resolvable:$true] %s21_s8 }
   0x3   :  { %s34_s28 = sshll.u32 %s297_s27, 4  ;;  %s298_s9 = smov [#allocation3]   ;;  %s35_s28 = int_to_ptr.vmem [resolvable:$true] %s34_s28 }
   0x4   :  { %37 = dma.hbm_to_vmem [thread:$0]  %s33_s26, 128, %s35_s28, [#allocation7]  }
   0x5   :  { %s23_s10 = sshll.u32 %s298_s9, 4  ;;  %s43_s13 = sshll.u32 %s374_s2, 4  ;;  %s24_s10 = int_to_ptr.vmem [resolvable:$true] %s23_s10  ;;  %s44_s13 = int_to_ptr.vmem [resolvable:$true] %s43_s13 }
   0x6   :  { %26 = dma.hbm_to_vmem [thread:$0]  %s22_s8, 128, %s24_s10, [#allocation4]  }
   0x7   :  { %s53_s15 = sshll.u32 %s376_s4, 4  ;;  %s299_s16 = smov [#allocation8]   ;;  %s54_s15 = int_to_ptr.hbm [resolvable:$true] %s53_s15 }
   0x8   :  { %46 = dma.vmem_to_smem %s44_s13, 16, %s299_s16, [#allocation5]  }
   0x9   :  { %s300_s17 = smov [#allocation9]   ;;  %s301_s18 = smov 128  }
   0xa   :  { %s55_s0 = sshll.u32 %s300_s17, 4  ;;  %s302_s19 = smov 8   ;;  %s56_s0 = int_to_ptr.vmem [resolvable:$true] %s55_s0 }
   0xb   :  { %61 = dma.hbm_to_vmem [thread:$0]  %s54_s15, 384, %s56_s0, [#allocation7], %s301_s18, %s301_s18, %s302_s19  }
   0xc   :  { %289 = dma.done.wait [#allocation4], 128  }
   0xd   :  { %290 = vsyncadd [#allocation4], 4294967168 }
   0xe   :  { %291 = dma.done.wait [#allocation7], 128  }
   0xf   :  { %292 = vsyncadd [#allocation7], 4294967168 }
  0x10   :  { %293 = dma.done.wait [#allocation5], 16  }
  0x11   :  { %294 = vsyncadd [#allocation5], 4294967280 }
  0x12   :  { %295 = dma.done.wait [#allocation7], 384  }
  0x13   :  { %296 = vsyncadd [#allocation7], 4294966912 }
  0x14   :  { %82 = sfence }
  0x15   :  { %s186_s2 = sld [smem:[#allocation8 + $0x1]]  ;;  %v125_v0 = vld [vmem:[#allocation6] sm:$0xff]  ;;  %v83_v1 = vld [vmem:[#allocation3] sm:$0xff]  ;;  %s303_s22 = smov 12   ;;  %vm143_vm0 = vcmask 1043456   ;;  %v133_v11 = vld [vmem:[#allocation9 + $0x8] sm:$0xff]  ;;  %v120_v22 = vstv %s375_s3 }
  0x16   :  { %s188_s4 = sld [smem:[#allocation8 + $0x3]]  ;;  %127 = vrot.lane.b32.xlu2 %v125_v0, %s303_s22  ;;  %s304_s23 = smov 127   ;;  %v134_v10 = vld [vmem:[#allocation9 + $0x10] sm:$0xf]  ;;  %v132_v12 = vld [vmem:[#allocation9] sm:$0xff]  ;;  %vm130_vm2 = vcmask 97280  }
  0x17   :  { %s187_s20 = sld [smem:[#allocation8 + $0x2]]  ;;  %s305_s24 = smov 125   ;;  %190 = vmatpush.msk.msra.mxu0 %vm143_vm0, %v134_v10  ;;  %vm139_vm3 = vcmask 162816   ;;  %v203_v29 = vld [vmem:[%s377_s5] ss:$0 sm:$0xff]  ;;  %vm177_vm5 = vcmask 7168  }
  0x18   :  { %s189_s21 = sld [smem:[#allocation8 + $0x4]]  ;;  %s306_s25 = smov 126   ;;  %v204_v32 = vld [vmem:[%s378_s6] ss:$0 sm:$0xff] }
  0x19   :  { %s307_s26 = smov 124   ;;  %161 = vmatpush.msra.mxu0 %v133_v11  ;;  %s84_s27 = sld [smem:[#allocation8]] }
  0x1b   :  { %v88_v2 = vstv %s186_s2  ;;  %162 = vmatpush.msra.mxu0 %v132_v12 }
  0x1c   :  { %v89_v3 = vmul.f32 %v88_v2, %v83_v1  ;;  %v104_v4 = vstv %s188_s4 }
  0x1d   :  { %v105_v5 = vmul.f32 %v104_v4, %v83_v1  ;;  %v96_v6 = vstv %s187_s20 }
  0x1e   :  { %91 = vrot.lane.b32.xlu0 %v89_v3, %s304_s23  ;;  %v112_v7 = vstv %s189_s21  ;;  %v97_v8 = vmul.f32 %v96_v6, %v83_v1 }
  0x1f   :  { %107 = vrot.lane.b32.xlu1 %v105_v5, %s305_s24  ;;  %v113_v9 = vmul.f32 %v112_v7, %v83_v1  ;;  %v85_v13 = vstv %s84_s27 }
  0x20   :  { %v86_v16 = vmul.f32 %v85_v13, %v83_v1 }
  0x26   :  { %99 = vrot.lane.b32.xlu0 %v97_v8, %s306_s25 }
  0x27   :  { %115 = vrot.lane.b32.xlu1 %v113_v9, %s307_s26 }
  0x70   :  { %v128_v26 = vpop.permute.xlu2 %127 }
  0x90   :  { %v92_v14 = vpop.permute.xlu0 %91 }
  0x91   :  { %v108_v15 = vpop.permute.xlu1 %107  ;;  %v94_v17 = vadd.f32 %v92_v14, %v86_v16 }
  0x98   :  { %v100_v18 = vpop.permute.xlu0 %99 }
  0x99   :  { %v102_v19 = vadd.f32 %v100_v18, %v94_v17  ;;  %v116_v20 = vpop.permute.xlu1 %115 }
  0x9b   :  { %v110_v21 = vadd.f32 %v108_v15, %v102_v19 }
  0x9d   :  { %v118_v23 = vadd.f32 %v116_v20, %v110_v21 }
  0x9f   :  { %v121_v24 = vadd.f32 %v120_v22, %v118_v23 }
  0xa1   :  { %v123_v25 = vmul.f32 0.01, %v121_v24  ;;  %vm122_vm1 = vcmp.ge.f32.partialorder %v121_v24, 0.0 }
  0xa3   :  { %v124_v27 = vsel %vm122_vm1, %v121_v24, %v123_v25 }
  0xa4   :  { %v131_v28 = vsel %vm130_vm2, %v124_v27, %v128_v26 }
  0xa5   :  { %191 = vmatmul.msk.f32.vlgmr.msra.gmra.mxu0 %vm139_vm3, %v131_v28 }
 0x122   :  { %v164_v30 = vpop.f32.mrf.mxu0 }
 0x123   :  { %v165_v31 = vadd.f32 %v203_v29, %v164_v30 }
 0x125   :  { %v168_v33 = vmul.f32 0.01, %v165_v31  ;;  %vm167_vm4 = vcmp.ge.f32.partialorder %v165_v31, 0.0 }
 0x127   :  { %v169_v34 = vsel %vm167_vm4, %v165_v31, %v168_v33 }
 0x128   :  { %v174_v35 = vmul.f32 %v204_v32, %v169_v34 }
 0x12a   :  { %175 = vadd.xlane.f32.xlu2 %v174_v35 }
 0x19d   :  { %v176_v36 = vpop.xlane.xlu2 %175 }
 0x19e   :  { %178 = vst.msk [vmem:[%s379_s7] sm:$0xff] %vm177_vm5, %v176_v36 }
 0x19f   :  { %183 = vsyncpa [#allocation4], 1 }
 0x1a0   :  { %184 = vsyncpa [#allocation7], 1 }
 0x1a1   :  { %185 = vsyncpa [#allocation5], 1 }

</bundles_post_ra>
